<compile_context>
chip_gen: v5e
topology: v5e:2x2
jax: 0.10.0
libtpu: 0.0.40
codegen_flags: <defaults>
</compile_context>

<pallas_src>
import jax
import jax.numpy as jnp
from jax.experimental import pallas as pl
from jax.experimental.pallas import tpu as pltpu

_LANE = 128
# 8192 x 128 x f32 = 4 MiB per block; (in + out) x double-buffer = 16 MiB.
_MAX_TILE_ROWS = 8192
_VMEM_LIMIT_BYTES = 32 << 20  # safe on v5e/v6e (128 MiB phys) and v7x (64 MiB phys)


def _mish_kernel(x_ref, o_ref):
    x = x_ref[...].astype(jnp.float32)
    # mish(x) = x * tanh(ln(1 + e^x)).  With u = e^x:
    #   tanh(ln(1 + u)) = (u^2 + 2u) / (u^2 + 2u + 2)
    # Stable single-exp form with t = exp(-|x|)  (t in (0, 1]):
    #   x >= 0:  ratio = (1 + 2t) / (1 + 2t + 2t^2)      (divide through by u^2)
    #   x <  0:  ratio = (t^2 + 2t) / (t^2 + 2t + 2)     (u = t)
    t = jnp.exp(-jnp.abs(x))
    t2 = t * t
    pos = x >= 0.0
    num = jnp.where(pos, 1.0 + 2.0 * t, t2 + 2.0 * t)
    den = jnp.where(pos, 1.0 + 2.0 * t + 2.0 * t2, t2 + 2.0 * t + 2.0)
    # Exact divide keeps us within ~1 ulp of the tanh(softplus) reference.
    # (pl.reciprocal(den, approx=True) would save a little EUP work but costs
    #  ~1e-4 relative error, more than the 1e-5 tolerance used below.)
    o_ref[...] = (x * (num / den)).astype(o_ref.dtype)


def mish(x):
    """Elementwise Mish. Accepts any shape / float dtype; runs a Pallas TPU kernel."""
    orig_shape = x.shape
    orig_dtype = x.dtype
    n = x.size

    flat = jnp.ravel(x)
    padded = (n % _LANE) != 0
    if padded:
        # Small pad to the next 128 multiple only (rare path).
        n_pad = ((n + _LANE - 1) // _LANE) * _LANE
        flat = jnp.pad(flat, (0, n_pad - n))
    else:
        n_pad = n
    rows = n_pad // _LANE
    x2d = flat.reshape(rows, _LANE)

    if rows <= _MAX_TILE_ROWS:
        # Single block covering the whole slab (full-extent sublane dim is
        # always a legal block shape, regardless of 8/16/32 alignment).
        block_rows = rows
        grid = (1,)
    else:
        block_rows = _MAX_TILE_ROWS  # multiple of 8/16/32 for all packings
        grid = (pl.cdiv(rows, block_rows),)  # partial tail block is masked

    out2d = pl.pallas_call(
        _mish_kernel,
        out_shape=jax.ShapeDtypeStruct((rows, _LANE), orig_dtype),
        grid_spec=pltpu.PrefetchScalarGridSpec(
            num_scalar_prefetch=0,
            grid=grid,
            in_specs=[pl.BlockSpec((block_rows, _LANE), lambda i: (i, 0))],
            out_specs=pl.BlockSpec((block_rows, _LANE), lambda i: (i, 0)),
        ),
        compiler_params=pltpu.CompilerParams(
            dimension_semantics=("parallel",),
            vmem_limit_bytes=_VMEM_LIMIT_BYTES,
        ),
    )(x2d)

    out_flat = out2d.reshape(-1)
    if padded:
        out_flat = out_flat[:n]
    return out_flat.reshape(orig_shape)


def _mish_ref(x):
    xf = x.astype(jnp.float32)
    return (xf * jnp.tanh(jax.nn.softplus(xf))).astype(x.dtype)


if __name__ == "__main__":
    key = jax.random.PRNGKey(0)

    # Small NCHW input consistent with a conv-net activation: (B=2, C=4, H=16, W=16).
    x = jax.random.normal(key, (2, 4, 16, 16), dtype=jnp.float32) * 3.0
    y = mish(x)
    jax.block_until_ready(y)
    y_ref = _mish_ref(x)
    assert y.shape == x.shape and y.dtype == x.dtype
    assert jnp.allclose(y, y_ref, atol=1e-5, rtol=1e-5), "mismatch vs reference"

    # Odd-sized shape (size not a multiple of 128) to exercise the pad path.
    x2 = jax.random.normal(jax.random.PRNGKey(1), (3, 5, 7, 9), dtype=jnp.float32) * 5.0
    y2 = mish(x2)
    jax.block_until_ready(y2)
    assert jnp.allclose(y2, _mish_ref(x2), atol=1e-5, rtol=1e-5), "mismatch (padded path)"

    # bf16 input (common activation dtype); compute happens in f32 inside the kernel.
    x3 = jax.random.normal(jax.random.PRNGKey(2), (2, 4, 16, 16), dtype=jnp.bfloat16)
    y3 = mish(x3)
    jax.block_until_ready(y3)
    assert y3.dtype == jnp.bfloat16
    assert jnp.allclose(
        y3.astype(jnp.float32), _mish_ref(x3).astype(jnp.float32), atol=2e-2, rtol=2e-2
    ), "mismatch (bf16 path)"

    print("KERNEL_OK")
</pallas_src>

<mosaic_0001>
module attributes {stable_mosaic.version = 11 : i64} {
  func.func @_mish_kernel(%arg0: i32, %arg1: memref<16x128xf32, #tpu.memory_space<vmem>>, %arg2: memref<16x128xf32, #tpu.memory_space<vmem>>) attributes {dimension_semantics = [#tpu.dimension_semantics<parallel>], iteration_bounds = array<i64: 1>, scalar_prefetch = 0 : i64, scratch_operands = 0 : i64, tpu.core_type = #tpu.core_type<tc>, window_params = [{transform_indices = @transform_0, window_bounds = array<i64: 16, 128>}, {transform_indices = @transform_1, window_bounds = array<i64: 16, 128>}]} {
    %c0 = arith.constant 0 : index
    %c0_0 = arith.constant 0 : index
    %0 = vector.load %arg1[%c0, %c0_0] : memref<16x128xf32, #tpu.memory_space<vmem>>, vector<16x128xf32>
    %1 = math.absf %0 : vector<16x128xf32>
    %cst = arith.constant 0.000000e+00 : f32
    %2 = vector.broadcast %cst : f32 to vector<16x128xf32>
    %3 = arith.subf %2, %1 : vector<16x128xf32>
    %4 = math.exp %3 : vector<16x128xf32>
    %5 = arith.mulf %4, %4 : vector<16x128xf32>
    %cst_1 = arith.constant 0.000000e+00 : f32
    %6 = vector.broadcast %cst_1 : f32 to vector<16x128xf32>
    %7 = arith.cmpf oge, %0, %6 : vector<16x128xf32>
    %cst_2 = arith.constant 2.000000e+00 : f32
    %8 = vector.broadcast %cst_2 : f32 to vector<16x128xf32>
    %9 = arith.mulf %8, %4 : vector<16x128xf32>
    %cst_3 = arith.constant 1.000000e+00 : f32
    %10 = vector.broadcast %cst_3 : f32 to vector<16x128xf32>
    %11 = arith.addf %10, %9 : vector<16x128xf32>
    %cst_4 = arith.constant 2.000000e+00 : f32
    %12 = vector.broadcast %cst_4 : f32 to vector<16x128xf32>
    %13 = arith.mulf %12, %4 : vector<16x128xf32>
    %14 = arith.addf %5, %13 : vector<16x128xf32>
    %15 = arith.select %7, %11, %14 : vector<16x128xi1>, vector<16x128xf32>
    %cst_5 = arith.constant 2.000000e+00 : f32
    %16 = vector.broadcast %cst_5 : f32 to vector<16x128xf32>
    %17 = arith.mulf %16, %4 : vector<16x128xf32>
    %cst_6 = arith.constant 1.000000e+00 : f32
    %18 = vector.broadcast %cst_6 : f32 to vector<16x128xf32>
    %19 = arith.addf %18, %17 : vector<16x128xf32>
    %cst_7 = arith.constant 2.000000e+00 : f32
    %20 = vector.broadcast %cst_7 : f32 to vector<16x128xf32>
    %21 = arith.mulf %20, %5 : vector<16x128xf32>
    %22 = arith.addf %19, %21 : vector<16x128xf32>
    %cst_8 = arith.constant 2.000000e+00 : f32
    %23 = vector.broadcast %cst_8 : f32 to vector<16x128xf32>
    %24 = arith.mulf %23, %4 : vector<16x128xf32>
    %25 = arith.addf %5, %24 : vector<16x128xf32>
    %cst_9 = arith.constant 2.000000e+00 : f32
    %26 = vector.broadcast %cst_9 : f32 to vector<16x128xf32>
    %27 = arith.addf %25, %26 : vector<16x128xf32>
    %28 = arith.select %7, %22, %27 : vector<16x128xi1>, vector<16x128xf32>
    %29 = arith.divf %15, %28 : vector<16x128xf32>
    %30 = arith.mulf %0, %29 : vector<16x128xf32>
    %c0_10 = arith.constant 0 : index
    %c0_11 = arith.constant 0 : index
    %31 = vector.load %arg2[%c0_10, %c0_11] : memref<16x128xf32, #tpu.memory_space<vmem>>, vector<16x128xf32>
    tpu.vector_store %arg2[%c0_10, %c0_11], %30 {strides = array<i32>} : memref<16x128xf32, #tpu.memory_space<vmem>>, vector<16x128xf32>,
    return
  }
  func.func @transform_0(%arg0: i32) -> (i32, i32) {
    %c0_i32 = arith.constant 0 : i32
    %c0_i32_0 = arith.constant 0 : i32
    return %arg0, %c0_i32 : i32, i32
  }
  func.func @transform_1(%arg0: i32) -> (i32, i32) {
    %c0_i32 = arith.constant 0 : i32
    %c0_i32_0 = arith.constant 0 : i32
    return %arg0, %c0_i32 : i32, i32
  }
}

</mosaic_0001>

<bundles_post_ra>
// kernel: tpu_custom_call.1
= control target key start
LH: loop header
LB: loop body
LE: loop exit
PB: predicated region body
PF: predicated region fallthrough
CT: control target
= control target key end

     0   :  { %6 = vsyncpa [#allocation3], 0  ;;  %s216_s0 = inlined_call_operand.hbm [shape: f32[16,128], index: 0, kind: input, shape index: {}]   ;;  %s217_s1 = inlined_call_operand.hbm [shape: f32[16,128], index: 1, kind: output, shape index: {}]  }
   0x1   :  { %7 = vsyncpa [#allocation4], 0  ;;  %s12_s8 = sshll.u32 %s216_s0, 4  ;;  %s172_s9 = smov [#allocation2]   ;;  %s13_s8 = int_to_ptr.hbm [resolvable:$true] %s12_s8 }
   0x2   :  { %s14_s10 = sshll.u32 %s172_s9, 4  ;;  %s173_s11 = smov 128   ;;  %s15_s10 = int_to_ptr.vmem [resolvable:$true] %s14_s10 }
   0x3   :  { %s174_s12 = smov 8  }
   0x4   :  { %20 = dma.hbm_to_vmem [thread:$0]  %s13_s8, 256, %s15_s10, [#allocation3], %s173_s11, %s173_s11, %s174_s12  }
   0x5   :  { %168 = dma.done.wait [#allocation3], 256  }
   0x6   :  { %169 = vsyncadd [#allocation3], 4294967040  ;;  %v192_v0 = vld [vmem:[#allocation2] sm:$0xff]  ;;  %v194_v1 = vld [vmem:[#allocation2 + $0x8] sm:$0xff]  ;;  %s175_s0 = smov [#allocation5]   ;;  %s95_s16 = sshll.u32 %s217_s1, 4  ;;  %s96_s16 = int_to_ptr.hbm [resolvable:$true] %s95_s16 }
   0x7   :  { %v27_v2 = vand.u32 2147483647, %v192_v0  ;;  %v28_v3 = vand.u32 2147483647, %v194_v1  ;;  %vm37_vm0 = vcmp.ge.f32.partialorder %v192_v0, 0.0  ;;  %vm38_vm1 = vcmp.ge.f32.partialorder %v194_v1, 0.0 }
   0x8   :  { %s93_s13 = sshll.u32 %s175_s0, 4  ;;  %s94_s13 = int_to_ptr.vmem [resolvable:$true] %s93_s13 }
   0x9   :  { %v29_v4 = vsub.f32 0.0, %v27_v2  ;;  %v30_v5 = vsub.f32 0.0, %v28_v3 }
   0xb   :  { %v31_v6 = vmul.f32 1.442695, %v29_v4  ;;  %v33_v7 = vmul.f32 1.442695, %v30_v5 }
   0xd   :  { %112 = vpow2.f32 %v31_v6 }
   0xe   :  { %114 = vpow2.f32 %v33_v7 }
  0x13   :  { %v113_v8 = vpop.eup %112 }
  0x14   :  { %v115_v9 = vpop.eup %114  ;;  %v35_v10 = vmul.f32 %v113_v8, %v113_v8  ;;  %v39_v11 = vmul.f32 2.0, %v113_v8 }
  0x15   :  { %v36_v12 = vmul.f32 %v115_v9, %v115_v9  ;;  %v40_v13 = vmul.f32 2.0, %v115_v9 }
  0x16   :  { %v41_v14 = vadd.f32 1.0, %v39_v11  ;;  %v43_v15 = vadd.f32 %v39_v11, %v35_v10  ;;  %v47_v16 = vmul.f32 2.0, %v35_v10 }
  0x17   :  { %v42_v17 = vadd.f32 1.0, %v40_v13  ;;  %v44_v18 = vadd.f32 %v40_v13, %v36_v12  ;;  %v48_v19 = vmul.f32 2.0, %v36_v12 }
  0x18   :  { %v49_v20 = vadd.f32 %v47_v16, %v41_v14  ;;  %v51_v21 = vadd.f32 2.0, %v43_v15  ;;  %v45_v40 = vsel %vm37_vm0, %v41_v14, %v43_v15 }
  0x19   :  { %v50_v22 = vadd.f32 %v48_v19, %v42_v17  ;;  %v52_v23 = vadd.f32 2.0, %v44_v18  ;;  %v46_v45 = vsel %vm38_vm1, %v42_v17, %v44_v18 }
  0x1a   :  { %v53_v24 = vsel %vm37_vm0, %v49_v20, %v51_v21 }
  0x1b   :  { %116 = vrcp.f32 %v53_v24  ;;  %v54_v25 = vsel %vm38_vm1, %v50_v22, %v52_v23  ;;  %vm60_vm2 = vweird.f32 %v53_v24  ;;  %v66_v29 = vand.u32 2147483648, %v53_v24 }
  0x1c   :  { %118 = vrcp.f32 %v54_v25  ;;  %v64_v31 = vand.u32 2147483647, %v53_v24  ;;  %vm75_vm4 = vweird.f32 %v54_v25  ;;  %v81_v33 = vand.u32 2147483648, %v54_v25 }
  0x1d   :  { %v79_v36 = vand.u32 2147483647, %v54_v25  ;;  %v67_v37 = vor.u32 1.1754944e-38, %v66_v29 }
  0x1e   :  { %vm65_vm7 = vcmp.eq.f32.partialorder %v64_v31, 8.507059e+37  ;;  %v82_v41 = vor.u32 1.1754944e-38, %v81_v33 }
  0x1f   :  { %vm80_vm9 = vcmp.eq.f32.partialorder %v79_v36, 8.507059e+37 }
  0x21   :  { %v117_v26 = vpop.eup %116 }
  0x22   :  { %v56_v27 = vmul.f32 %v117_v26, %v53_v24  ;;  %v119_v28 = vpop.eup %118  ;;  %vm61_vm3 = vweird.f32 %v117_v26 }
  0x23   :  { %v71_v32 = vmul.f32 %v119_v28, %v54_v25  ;;  %vm76_vm5 = vweird.f32 %v119_v28  ;;  %vm62_vm6 = vmor %vm60_vm2, %vm61_vm3 }
  0x24   :  { %v57_v30 = vsub.f32 1.0, %v56_v27  ;;  %vm77_vm8 = vmor %vm75_vm4, %vm76_vm5 }
  0x25   :  { %v72_v35 = vsub.f32 1.0, %v71_v32 }
  0x26   :  { %v58_v34 = vmul.f32 %v117_v26, %v57_v30 }
  0x27   :  { %v73_v39 = vmul.f32 %v119_v28, %v72_v35 }
  0x28   :  { %v59_v38 = vadd.f32 %v117_v26, %v58_v34 }
  0x29   :  { %v74_v43 = vadd.f32 %v119_v28, %v73_v39 }
  0x2a   :  { %v63_v42 = vsel %vm62_vm6, %v117_v26, %v59_v38 }
  0x2b   :  { %v68_v44 = vsel %vm65_vm7, %v67_v37, %v63_v42  ;;  %v78_v47 = vsel %vm77_vm8, %v119_v28, %v74_v43 }
  0x2c   :  { %v69_v46 = vmul.f32 %v68_v44, %v45_v40  ;;  %v83_v48 = vsel %vm80_vm9, %v82_v41, %v78_v47 }
  0x2d   :  { %v84_v50 = vmul.f32 %v83_v48, %v46_v45 }
  0x2e   :  { %v85_v49 = vmul.f32 %v69_v46, %v192_v0 }
  0x2f   :  { %v86_v51 = vmul.f32 %v84_v50, %v194_v1 }
  0x30   :  { %87 = vst [vmem:[#allocation5] sm:$0xff] %v85_v49 }
  0x31   :  { %88 = vst [vmem:[#allocation5 + $0x8] sm:$0xff] %v86_v51 }
  0x32   :  { %101 = dma.vmem_to_hbm [thread:$0]  %s94_s13, 256, %s96_s16, [#allocation4], %s173_s11, %s173_s11, %s174_s12  }
  0x33   :  { %170 = dma.done.wait [#allocation4], 256  }
  0x34   :  { %171 = vsyncadd [#allocation4], 4294967040 }
  0x35   :  { %106 = vsyncpa [#allocation3], 1 }
  0x36   :  { %107 = vsyncpa [#allocation4], 1 }

</bundles_post_ra>
